<compile_context>
chip_gen: v7x
topology: tpu7x:2x2x1
jax: 0.10.0
libtpu: 0.0.40
codegen_flags: <defaults>
</compile_context>

<pallas_src>
import jax
import jax.numpy as jnp
from jax.experimental import pallas as pl
from jax.experimental.pallas import tpu as pltpu


def _round_up(x: int, m: int) -> int:
    return ((x + m - 1) // m) * m


def _cdiv(a: int, b: int) -> int:
    return -(-a // b)


# ---------------------------------------------------------------------------
# Kernel body: fused 2-layer MLP tile.  ReLU(Z@W1 + b1) @ W2 + b2.
# Matmuls run on the MXU with f32 accumulation; bias + ReLU stay f32.
# Z is cast to the matmul dtype *inside* the kernel (no HBM bf16 copy).
# ---------------------------------------------------------------------------
def _ffn_kernel(z_ref, w1_ref, b1_ref, w2_ref, b2_ref, out_ref):
    z = z_ref[...].astype(w1_ref.dtype)
    h = jnp.dot(z, w1_ref[...], preferred_element_type=jnp.float32)
    h = jnp.maximum(h + b1_ref[...], 0.0)
    y = jnp.dot(h.astype(w2_ref.dtype), w2_ref[...],
                preferred_element_type=jnp.float32)
    out_ref[...] = (y + b2_ref[...]).astype(out_ref.dtype)


# ---------------------------------------------------------------------------
# One-time parameter preparation (do this at model load, not per forward).
# Weights are stored (in_features, out_features) == PyTorch's x @ W.T layout.
# ---------------------------------------------------------------------------
def prepare_ffn_params(W1, b1, W2, b2, *, matmul_dtype=jnp.bfloat16):
    D, H = W1.shape
    O = W2.shape[1]
    Hp, Op = _round_up(H, 128), _round_up(O, 128)
    W1p = jnp.pad(jnp.asarray(W1).astype(matmul_dtype), ((0, 0), (0, Hp - H)))
    b1p = jnp.pad(jnp.asarray(b1, jnp.float32).reshape(1, H), ((0, 0), (0, Hp - H)))
    W2p = jnp.pad(jnp.asarray(W2).astype(matmul_dtype), ((0, Hp - H), (0, Op - O)))
    b2p = jnp.pad(jnp.asarray(b2, jnp.float32).reshape(1, O), ((0, 0), (0, Op - O)))
    return dict(W1p=W1p, b1p=b1p, W2p=W2p, b2p=b2p,
                D=D, H=H, O=O, Hp=Hp, Op=Op,
                matmul_dtype=jnp.dtype(matmul_dtype))


def _vmem_budget_bytes() -> int:
    try:
        cap = int(pltpu.get_tpu_info().vmem_capacity_bytes)
    except Exception:
        cap = 64 * 1024 * 1024  # conservative (v7x per-TC)
    return int(cap * 0.8)       # leave headroom for Mosaic internal scratch / XLA


def _footprint_bytes(tn, D, Hp, Op, mm_bytes, z_bytes, weight_buffers):
    z_tiles = 2 * tn * D * z_bytes                     # double-buffered Z tiles
    out_tiles = 2 * tn * Op * 4                        # double-buffered out tiles
    weights = weight_buffers * ((D * Hp + Hp * Op) * mm_bytes + (Hp + Op) * 4)
    interm = tn * Hp * 4 + tn * (D + Hp) * mm_bytes    # f32 h + in-kernel casts
    return z_tiles + out_tiles + weights + interm


def _forward_impl(Z, p, block_rows, single_buffer_weights):
    N, D = Z.shape
    assert D == p["D"], (D, p["D"])
    Hp, Op, O = p["Hp"], p["Op"], p["O"]
    mm_bytes = p["matmul_dtype"].itemsize
    z_bytes = jnp.dtype(Z.dtype).itemsize

    budget = _vmem_budget_bytes()
    if block_rows is None:
        block_rows = 1024 if budget >= 80 * 1024 * 1024 else 512

    use_single = single_buffer_weights and hasattr(pl, "Buffered")
    weight_buffers = 1 if use_single else 2

    # Pick TN to minimize ragged-tile waste, then shrink until it fits VMEM.
    n_blocks = max(1, _cdiv(N, block_rows))
    TN = max(8, min(_round_up(_cdiv(N, n_blocks), 8), _round_up(N, 8)))
    while TN > 8 and _footprint_bytes(TN, D, Hp, Op, mm_bytes, z_bytes,
                                      weight_buffers) > budget:
        TN = max(8, _round_up(TN // 2, 8))

    footprint = _footprint_bytes(TN, D, Hp, Op, mm_bytes, z_bytes, weight_buffers)
    vmem_limit = int(min(budget, max(int(footprint * 1.25), 16 * 1024 * 1024)))

    grid = (pl.cdiv(N, TN),)   # ragged last tile: OOB reads unused, writes dropped

    cost = pl.CostEstimate(
        flops=2 * N * (D * Hp + Hp * Op),
        transcendentals=0,
        bytes_accessed=(N * D * z_bytes + N * Op * 4
                        + (D * Hp + Hp * Op) * mm_bytes + (Hp + Op) * 4),
    )

    # Resident weights/biases: constant index_map; optionally single-buffered.
    if use_single:
        wmode = pl.Buffered(1)
        def wspec(shape):
            return pl.BlockSpec(shape, lambda i: (0, 0), pipeline_mode=wmode)
    else:
        def wspec(shape):
            return pl.BlockSpec(shape, lambda i: (0, 0))

    out = pl.pallas_call(
        _ffn_kernel,
        out_shape=jax.ShapeDtypeStruct((N, Op), jnp.float32),
        grid=grid,
        in_specs=[
            pl.BlockSpec((TN, D), lambda i: (i, 0)),   # Z tile tracks the grid
            wspec((D, Hp)),                            # W1 (VMEM-resident)
            wspec((1, Hp)),                            # b1
            wspec((Hp, Op)),                           # W2
            wspec((1, Op)),                            # b2
        ],
        out_specs=pl.BlockSpec((TN, Op), lambda i: (i, 0)),
        compiler_params=pltpu.CompilerParams(
            dimension_semantics=("parallel",),          # v7x: shard tiles over TCs
            vmem_limit_bytes=vmem_limit,
        ),
        cost_estimate=cost,
    )(Z, p["W1p"], p["b1p"], p["W2p"], p["b2p"])

    return out[:, :O]   # drop lane padding of the (small) output only


def ffn_predictor_forward(Z, params, *, block_rows=None):
    """Forward pass: Z (N, D) f32 -> (N, n_tasks*n_targets) f32.

    `params` comes from prepare_ffn_params (pad/cast done once at model load).
    """
    try:
        return _forward_impl(Z, params, block_rows, single_buffer_weights=True)
    except Exception:
        # Fallback for JAX versions where Buffered(1) single-buffering of the
        # resident weight blocks is not supported.
        return _forward_impl(Z, params, block_rows, single_buffer_weights=False)


def reference_forward(Z, W1, b1, W2, b2):
    h = jnp.maximum(Z @ W1 + b1, 0.0)
    return h @ W2 + b2


if __name__ == "__main__":
    # Small, module-consistent shapes:
    #   batch n=8, input_dim d=32, hidden_dim=64, n_tasks=4, n_targets=1 -> output_dim=4
    N, D, H = 8, 32, 64
    N_TASKS, N_TARGETS = 4, 1
    O = N_TASKS * N_TARGETS

    key = jax.random.PRNGKey(0)
    k_z, k_w1, k_b1, k_w2, k_b2 = jax.random.split(key, 5)

    Z = jax.random.normal(k_z, (N, D), dtype=jnp.float32)

    # PyTorch Linear-style uniform(-1/sqrt(fan_in), 1/sqrt(fan_in)) init.
    bound1 = 1.0 / (D ** 0.5)
    W1 = jax.random.uniform(k_w1, (D, H), minval=-bound1, maxval=bound1, dtype=jnp.float32)
    b1 = jax.random.uniform(k_b1, (1, H), minval=-bound1, maxval=bound1, dtype=jnp.float32)
    bound2 = 1.0 / (H ** 0.5)
    W2 = jax.random.uniform(k_w2, (H, O), minval=-bound2, maxval=bound2, dtype=jnp.float32)
    b2 = jax.random.uniform(k_b2, (1, O), minval=-bound2, maxval=bound2, dtype=jnp.float32)

    y_ref = reference_forward(Z, W1, b1, W2, b2)

    # Default path: bf16 matmul inputs (v6e/v7x MXU peak), f32 accumulate.
    params_bf16 = prepare_ffn_params(W1, b1, W2, b2, matmul_dtype=jnp.bfloat16)
    y_bf16 = jax.block_until_ready(ffn_predictor_forward(Z, params_bf16))
    assert y_bf16.shape == (N, O), y_bf16.shape
    assert jnp.allclose(y_bf16, y_ref, atol=5e-2, rtol=5e-2), "bf16 mismatch vs reference"

    # f32 validation path (matches the PyTorch module numerics tightly).
    params_f32 = prepare_ffn_params(W1, b1, W2, b2, matmul_dtype=jnp.float32)
    y_f32 = jax.block_until_ready(ffn_predictor_forward(Z, params_f32))
    assert y_f32.shape == (N, O), y_f32.shape
    assert jnp.allclose(y_f32, y_ref, atol=1e-5, rtol=1e-5), "f32 mismatch vs reference"

    # TODO(synk): encode(Z, i) (partial-MLP slicing), train_step/criterion and
    # output_transform (Identity by default) are training/introspection paths,
    # not part of the forward hot path.
    print("KERNEL_OK")
</pallas_src>

<mosaic_0001>
module attributes {stable_mosaic.version = 11 : i64} {
  func.func @_ffn_kernel(%arg0: i32, %arg1: memref<8x32xf32, #tpu.memory_space<vmem>>, %arg2: memref<32x128xbf16, #tpu.memory_space<vmem>>, %arg3: memref<1x128xf32, #tpu.memory_space<vmem>>, %arg4: memref<128x128xbf16, #tpu.memory_space<vmem>>, %arg5: memref<1x128xf32, #tpu.memory_space<vmem>>, %arg6: memref<8x128xf32, #tpu.memory_space<vmem>>) attributes {dimension_semantics = [#tpu.dimension_semantics<parallel>], iteration_bounds = array<i64: 1>, scalar_prefetch = 0 : i64, scratch_operands = 0 : i64, tpu.core_type = #tpu.core_type<tc>, window_params = [{transform_indices = @transform_0, window_bounds = array<i64: 8, 32>}, {pipeline_mode = #tpu.pipeline_mode<synchronous>, transform_indices = @transform_1, window_bounds = array<i64: 32, 128>}, {pipeline_mode = #tpu.pipeline_mode<synchronous>, transform_indices = @transform_2, window_bounds = array<i64: 1, 128>}, {pipeline_mode = #tpu.pipeline_mode<synchronous>, transform_indices = @transform_3, window_bounds = array<i64: 128, 128>}, {pipeline_mode = #tpu.pipeline_mode<synchronous>, transform_indices = @transform_4, window_bounds = array<i64: 1, 128>}, {transform_indices = @transform_5, window_bounds = array<i64: 8, 128>}]} {
    %c0 = arith.constant 0 : index
    %c0_0 = arith.constant 0 : index
    %0 = vector.load %arg1[%c0, %c0_0] : memref<8x32xf32, #tpu.memory_space<vmem>>, vector<8x32xf32>
    %1 = arith.truncf %0 : vector<8x32xf32> to vector<8x32xbf16>
    %c0_1 = arith.constant 0 : index
    %c0_2 = arith.constant 0 : index
    %2 = vector.load %arg2[%c0_1, %c0_2] : memref<32x128xbf16, #tpu.memory_space<vmem>>, vector<32x128xbf16>
    %cst = arith.constant dense<0.000000e+00> : vector<8x128xf32>
    %3 = tpu.matmul %1, %2, %cst {dimension_numbers = #tpu.dot_dimension_numbers<[1], [0], [0], [1], [0, 0, 1, 1], [], []>} : vector<8x32xbf16>, vector<32x128xbf16>, vector<8x128xf32> -> vector<8x128xf32>
    %c0_3 = arith.constant 0 : index
    %c0_4 = arith.constant 0 : index
    %4 = vector.load %arg3[%c0_3, %c0_4] : memref<1x128xf32, #tpu.memory_space<vmem>>, vector<1x128xf32>
    %5 = vector.broadcast %4 : vector<1x128xf32> to vector<8x128xf32>
    %6 = arith.addf %3, %5 : vector<8x128xf32>
    %cst_5 = arith.constant 0.000000e+00 : f32
    %7 = vector.broadcast %cst_5 : f32 to vector<8x128xf32>
    %8 = arith.maximumf %6, %7 : vector<8x128xf32>
    %9 = arith.truncf %8 : vector<8x128xf32> to vector<8x128xbf16>
    %c0_6 = arith.constant 0 : index
    %c0_7 = arith.constant 0 : index
    %10 = vector.load %arg4[%c0_6, %c0_7] : memref<128x128xbf16, #tpu.memory_space<vmem>>, vector<128x128xbf16>
    %cst_8 = arith.constant dense<0.000000e+00> : vector<8x128xf32>
    %11 = tpu.matmul %9, %10, %cst_8 {dimension_numbers = #tpu.dot_dimension_numbers<[1], [0], [0], [1], [0, 0, 1, 1], [], []>} : vector<8x128xbf16>, vector<128x128xbf16>, vector<8x128xf32> -> vector<8x128xf32>
    %c0_9 = arith.constant 0 : index
    %c0_10 = arith.constant 0 : index
    %12 = vector.load %arg5[%c0_9, %c0_10] : memref<1x128xf32, #tpu.memory_space<vmem>>, vector<1x128xf32>
    %13 = vector.broadcast %12 : vector<1x128xf32> to vector<8x128xf32>
    %14 = arith.addf %11, %13 : vector<8x128xf32>
    %c0_11 = arith.constant 0 : index
    %c0_12 = arith.constant 0 : index
    %15 = vector.load %arg6[%c0_11, %c0_12] : memref<8x128xf32, #tpu.memory_space<vmem>>, vector<8x128xf32>
    tpu.vector_store %arg6[%c0_11, %c0_12], %14 {strides = array<i32>} : memref<8x128xf32, #tpu.memory_space<vmem>>, vector<8x128xf32>,
    return
  }
  func.func @transform_0(%arg0: i32) -> (i32, i32) {
    %c0_i32 = arith.constant 0 : i32
    %c0_i32_0 = arith.constant 0 : i32
    return %arg0, %c0_i32 : i32, i32
  }
  func.func @transform_1(%arg0: i32) -> (i32, i32) {
    %c0_i32 = arith.constant 0 : i32
    %c0_i32_0 = arith.constant 0 : i32
    %c0_i32_1 = arith.constant 0 : i32
    return %c0_i32, %c0_i32_0 : i32, i32
  }
  func.func @transform_2(%arg0: i32) -> (i32, i32) {
    %c0_i32 = arith.constant 0 : i32
    %c0_i32_0 = arith.constant 0 : i32
    %c0_i32_1 = arith.constant 0 : i32
    return %c0_i32, %c0_i32_0 : i32, i32
  }
  func.func @transform_3(%arg0: i32) -> (i32, i32) {
    %c0_i32 = arith.constant 0 : i32
    %c0_i32_0 = arith.constant 0 : i32
    %c0_i32_1 = arith.constant 0 : i32
    return %c0_i32, %c0_i32_0 : i32, i32
  }
  func.func @transform_4(%arg0: i32) -> (i32, i32) {
    %c0_i32 = arith.constant 0 : i32
    %c0_i32_0 = arith.constant 0 : i32
    %c0_i32_1 = arith.constant 0 : i32
    return %c0_i32, %c0_i32_0 : i32, i32
  }
  func.func @transform_5(%arg0: i32) -> (i32, i32) {
    %c0_i32 = arith.constant 0 : i32
    %c0_i32_0 = arith.constant 0 : i32
    return %arg0, %c0_i32 : i32, i32
  }
}

module attributes {stable_mosaic.version = 11 : i64} {
  func.func @_ffn_kernel(%arg0: i32, %arg1: memref<8x32xf32, #tpu.memory_space<vmem>>, %arg2: memref<32x128xbf16, #tpu.memory_space<vmem>>, %arg3: memref<1x128xf32, #tpu.memory_space<vmem>>, %arg4: memref<128x128xbf16, #tpu.memory_space<vmem>>, %arg5: memref<1x128xf32, #tpu.memory_space<vmem>>, %arg6: memref<8x128xf32, #tpu.memory_space<vmem>>) attributes {dimension_semantics = [#tpu.dimension_semantics<parallel>], iteration_bounds = array<i64: 1>, scalar_prefetch = 0 : i64, scratch_operands = 0 : i64, tpu.core_type = #tpu.core_type<tc>, window_params = [{transform_indices = @transform_0, window_bounds = array<i64: 8, 32>}, {pipeline_mode = #tpu.pipeline_mode<synchronous>, transform_indices = @transform_1, window_bounds = array<i64: 32, 128>}, {pipeline_mode = #tpu.pipeline_mode<synchronous>, transform_indices = @transform_2, window_bounds = array<i64: 1, 128>}, {pipeline_mode = #tpu.pipeline_mode<synchronous>, transform_indices = @transform_3, window_bounds = array<i64: 128, 128>}, {pipeline_mode = #tpu.pipeline_mode<synchronous>, transform_indices = @transform_4, window_bounds = array<i64: 1, 128>}, {transform_indices = @transform_5, window_bounds = array<i64: 8, 128>}]} {
    %c0 = arith.constant 0 : index
    %c0_0 = arith.constant 0 : index
    %0 = vector.load %arg1[%c0, %c0_0] : memref<8x32xf32, #tpu.memory_space<vmem>>, vector<8x32xf32>
    %1 = arith.truncf %0 : vector<8x32xf32> to vector<8x32xbf16>
    %c0_1 = arith.constant 0 : index
    %c0_2 = arith.constant 0 : index
    %2 = vector.load %arg2[%c0_1, %c0_2] : memref<32x128xbf16, #tpu.memory_space<vmem>>, vector<32x128xbf16>
    %cst = arith.constant dense<0.000000e+00> : vector<8x128xf32>
    %3 = tpu.matmul %1, %2, %cst {dimension_numbers = #tpu.dot_dimension_numbers<[1], [0], [0], [1], [0, 0, 1, 1], [], []>} : vector<8x32xbf16>, vector<32x128xbf16>, vector<8x128xf32> -> vector<8x128xf32>
    %c0_3 = arith.constant 0 : index
    %c0_4 = arith.constant 0 : index
    %4 = vector.load %arg3[%c0_3, %c0_4] : memref<1x128xf32, #tpu.memory_space<vmem>>, vector<1x128xf32>
    %5 = vector.broadcast %4 : vector<1x128xf32> to vector<8x128xf32>
    %6 = arith.addf %3, %5 : vector<8x128xf32>
    %cst_5 = arith.constant 0.000000e+00 : f32
    %7 = vector.broadcast %cst_5 : f32 to vector<8x128xf32>
    %8 = arith.maximumf %6, %7 : vector<8x128xf32>
    %9 = arith.truncf %8 : vector<8x128xf32> to vector<8x128xbf16>
    %c0_6 = arith.constant 0 : index
    %c0_7 = arith.constant 0 : index
    %10 = vector.load %arg4[%c0_6, %c0_7] : memref<128x128xbf16, #tpu.memory_space<vmem>>, vector<128x128xbf16>
    %cst_8 = arith.constant dense<0.000000e+00> : vector<8x128xf32>
    %11 = tpu.matmul %9, %10, %cst_8 {dimension_numbers = #tpu.dot_dimension_numbers<[1], [0], [0], [1], [0, 0, 1, 1], [], []>} : vector<8x128xbf16>, vector<128x128xbf16>, vector<8x128xf32> -> vector<8x128xf32>
    %c0_9 = arith.constant 0 : index
    %c0_10 = arith.constant 0 : index
    %12 = vector.load %arg5[%c0_9, %c0_10] : memref<1x128xf32, #tpu.memory_space<vmem>>, vector<1x128xf32>
    %13 = vector.broadcast %12 : vector<1x128xf32> to vector<8x128xf32>
    %14 = arith.addf %11, %13 : vector<8x128xf32>
    %c0_11 = arith.constant 0 : index
    %c0_12 = arith.constant 0 : index
    %15 = vector.load %arg6[%c0_11, %c0_12] : memref<8x128xf32, #tpu.memory_space<vmem>>, vector<8x128xf32>
    tpu.vector_store %arg6[%c0_11, %c0_12], %14 {strides = array<i32>} : memref<8x128xf32, #tpu.memory_space<vmem>>, vector<8x128xf32>,
    return
  }
  func.func @transform_0(%arg0: i32) -> (i32, i32) {
    %c0_i32 = arith.constant 0 : i32
    %c0_i32_0 = arith.constant 0 : i32
    return %arg0, %c0_i32 : i32, i32
  }
  func.func @transform_1(%arg0: i32) -> (i32, i32) {
    %c0_i32 = arith.constant 0 : i32
    %c0_i32_0 = arith.constant 0 : i32
    %c0_i32_1 = arith.constant 0 : i32
    return %c0_i32, %c0_i32_0 : i32, i32
  }
  func.func @transform_2(%arg0: i32) -> (i32, i32) {
    %c0_i32 = arith.constant 0 : i32
    %c0_i32_0 = arith.constant 0 : i32
    %c0_i32_1 = arith.constant 0 : i32
    return %c0_i32, %c0_i32_0 : i32, i32
  }
  func.func @transform_3(%arg0: i32) -> (i32, i32) {
    %c0_i32 = arith.constant 0 : i32
    %c0_i32_0 = arith.constant 0 : i32
    %c0_i32_1 = arith.constant 0 : i32
    return %c0_i32, %c0_i32_0 : i32, i32
  }
  func.func @transform_4(%arg0: i32) -> (i32, i32) {
    %c0_i32 = arith.constant 0 : i32
    %c0_i32_0 = arith.constant 0 : i32
    %c0_i32_1 = arith.constant 0 : i32
    return %c0_i32, %c0_i32_0 : i32, i32
  }
  func.func @transform_5(%arg0: i32) -> (i32, i32) {
    %c0_i32 = arith.constant 0 : i32
    %c0_i32_0 = arith.constant 0 : i32
    return %arg0, %c0_i32 : i32, i32
  }
}

</mosaic_0001>

<bundles_post_ra>
// kernel: tpu_custom_call.1
= control target key start
LH: loop header
LB: loop body
LE: loop exit
PB: predicated region body
PF: predicated region fallthrough
CT: control target
= control target key end

     0   :  { %10 = vsyncpa [#allocation3], 0  ;;  %s523_s0 = inlined_call_operand.hbm [shape: f32[8,32], index: 0, kind: input, shape index: {}]   ;;  %s524_s1 = inlined_call_operand.hbm [shape: bf16[32,128], index: 1, kind: input, shape index: {}]   ;;  %s525_s2 = inlined_call_operand.vmem [shape: f32[1,128], index: 2, kind: input, shape index: {}]   ;;  %s526_s3 = inlined_call_operand.hbm [shape: bf16[128,128], index: 3, kind: input, shape index: {}]   ;;  %s527_s4 = inlined_call_operand.vmem [shape: f32[1,128], index: 4, kind: input, shape index: {}]   ;;  %s528_s5 = inlined_call_operand.hbm [shape: f32[8,128], index: 5, kind: output, shape index: {}]  }
   0x1   :  { %11 = vsyncpa [#allocation6], 0 }
   0x2   :  { %12 = vsyncpa [#allocation4], 0  ;;  %s425_s18 = smov [#allocation5]   ;;  %s331_s22 = scalar_lea.hbm %s524_s1, 256 }
   0x3   :  { %s28_s19 = sshll.u32 %s425_s18, 4  ;;  %p332_p0 = scmp.ne.s32.totalorder %s524_s1, %s331_s22  ;;  %s29_s19 = int_to_ptr.vmem [resolvable:$true] %s28_s19 }
   0x4   :  { %p335_p1 = scmp.lt.u32.totalorder %s331_s22, %s524_s1 }
   0x6   :  { %p337_p2 = pnand %p335_p1, %p332_p0 }
   0x8   :  { %340 = shalt.err (!%p337_p2)
}
   0x9   :  { %s341_s27 = scalar_lea.vmem %s29_s19, 256  ;;  %p346_p4 = scmp.lt.s32.totalorder %s29_s19, %s29_s19 }
   0xa   :  { %p342_p3 = scmp.ne.s32.totalorder %s29_s19, %s341_s27  ;;  %p347_p5 = scmp.lt.s32.totalorder %s341_s27, %s341_s27 }
   0xc   :  { %p348_p6 = por %p347_p5, %p346_p4 }
   0xe   :  { %p349_p7 = pnand %p348_p6, %p342_p3 }
  0x10   :  { %352 = shalt.err (!%p349_p7)
}
  0x11   :  { %s426_s28 = smov 64   ;;  %s427_s29 = smov 4  }
  0x12   :  { %34 = dma.hbm_to_vmem [thread:$0]  %s524_s1, 256, %s29_s19, [#allocation6], %s426_s28, %s426_s28, %s427_s29  }
  0x13   :  { %s428_s7 = smov [#allocation2]   ;;  %s429_s9 = smov [#allocation7]  }
  0x14   :  { %s19_s8 = sshll.u32 %s428_s7, 4  ;;  %s42_s10 = sshll.u32 %s429_s9, 4  ;;  %s20_s8 = int_to_ptr.vmem [resolvable:$true] %s19_s8  ;;  %s43_s10 = int_to_ptr.vmem [resolvable:$true] %s42_s10 }
  0x15   :  { %s353_s13 = scalar_lea.hbm %s523_s0, 128 }
  0x16   :  { %p354_p8 = scmp.ne.s32.totalorder %s523_s0, %s353_s13  ;;  %p357_p9 = scmp.lt.u32.totalorder %s353_s13, %s523_s0 }
  0x18   :  { %p359_p10 = pnand %p357_p9, %p354_p8 }
  0x1a   :  { %362 = shalt.err (!%p359_p10)
}
  0x1b   :  { %s363_s1 = scalar_lea.vmem %s20_s8, 128  ;;  %p368_p12 = scmp.lt.s32.totalorder %s20_s8, %s20_s8 }
  0x1c   :  { %p364_p11 = scmp.ne.s32.totalorder %s20_s8, %s363_s1  ;;  %p369_p13 = scmp.lt.s32.totalorder %s363_s1, %s363_s1 }
  0x1e   :  { %p370_p0 = por %p369_p13, %p368_p12 }
  0x20   :  { %p371_p1 = pnand %p370_p0, %p364_p11 }
  0x22   :  { %374 = shalt.err (!%p371_p1)
}
  0x23   :  { %22 = dma.hbm_to_vmem [thread:$0]  %s523_s0, 128, %s20_s8, [#allocation3]  }
  0x24   :  { %s375_s22 = scalar_lea.hbm %s526_s3, 1024 }
  0x25   :  { %p376_p2 = scmp.ne.s32.totalorder %s526_s3, %s375_s22  ;;  %p379_p3 = scmp.lt.u32.totalorder %s375_s22, %s526_s3 }
  0x27   :  { %p381_p4 = pnand %p379_p3, %p376_p2 }
  0x29   :  { %384 = shalt.err (!%p381_p4)
}
  0x2a   :  { %s385_s27 = scalar_lea.vmem %s43_s10, 1024  ;;  %p390_p6 = scmp.lt.s32.totalorder %s43_s10, %s43_s10 }
  0x2b   :  { %p386_p5 = scmp.ne.s32.totalorder %s43_s10, %s385_s27  ;;  %p391_p7 = scmp.lt.s32.totalorder %s385_s27, %s385_s27 }
  0x2d   :  { %p392_p8 = por %p391_p7, %p390_p6 }
  0x2f   :  { %p393_p9 = pnand %p392_p8, %p386_p5 }
  0x31   :  { %396 = shalt.err (!%p393_p9)
}
  0x32   :  { %48 = dma.hbm_to_vmem [thread:$0]  %s526_s3, 1024, %s43_s10, [#allocation6], %s426_s28, %s426_s28, %s427_s29  }
  0x33   :  { %419 = dma.done.wait [#allocation3], 128  }
  0x34   :  { %420 = vsyncadd [#allocation3], 4294967168 }
  0x35   :  { %421 = dma.done.wait [#allocation6], 1280  }
  0x36   :  { %422 = vsyncadd [#allocation6], 4294966016  ;;  %v430_v0 = vmov 0.0   ;;  %vm431_vm0 = vmmov 0   ;;  %v321_v1 = vld [vmem:[#allocation5] sm:$0xff]   ;;  %v322_v2 = vld [vmem:[#allocation5 + $0x8] sm:$0xff]  }
  0x37   :  { %285 = vmatprep.subr.bf16.mxu0 %v430_v0  ;;  %289 = vmatprep.mubr.msk.bf16.mxu0 %vm431_vm0, %v430_v0  ;;  %v61_v3 = vld [vmem:[#allocation2] sm:$0xff]  ;;  %v323_v4 = vld [vmem:[#allocation7] sm:$0xff]   ;;  %vm86_vm1 = vcmask 261120   ;;  %v325_v7 = vld [vmem:[#allocation7 + $0x10] sm:$0xff]   ;;  %s432_s7 = smov [#allocation8]  }
  0x38   :  { %293 = vmatprep.subr.bf16.mxu1 %v430_v0  ;;  %309 = vmatprep.mubr.msk.bf16.mxu1 %vm431_vm0, %v430_v0  ;;  %v62_v5 = vpack.c.bf16 %v61_v3, %v61_v3  ;;  %v324_v6 = vld [vmem:[#allocation7 + $0x8] sm:$0xff]   ;;  %v326_v8 = vld [vmem:[#allocation7 + $0x18] sm:$0xff]   ;;  %v327_v9 = vld [vmem:[#allocation7 + $0x20] sm:$0xff]   ;;  %s250_s8 = sshll.u32 %s432_s7, 4  ;;  %s251_s8 = int_to_ptr.vmem [resolvable:$true] %s250_s8 }
  0x39   :  { %286 = vmatpush3.bf16.msra.mxu0 %v321_v1  ;;  %294 = vmatpush3.bf16.msra.mxu1 %v323_v4  ;;  %v328_v10 = vld [vmem:[#allocation7 + $0x28] sm:$0xff]   ;;  %v329_v11 = vld [vmem:[#allocation7 + $0x30] sm:$0xff]   ;;  %v330_v12 = vld [vmem:[#allocation7 + $0x38] sm:$0xff]   ;;  %p402_p11 = scmp.lt.s32.totalorder %s251_s8, %s251_s8 }
  0x3a   :  { %287 = vmatprep.subr.bf16.mxu0 %v430_v0  ;;  %295 = vmatprep.subr.bf16.mxu1 %v430_v0  ;;  %v260_v13 = vld [vmem:[%s525_s2] ss:$0 sm:$0xff]  ;;  %s397_s2 = scalar_lea.vmem %s251_s8, 128 }
  0x3b   :  { %v264_v21 = vld [vmem:[%s527_s4] ss:$0 sm:$0xff]  ;;  %p398_p10 = scmp.ne.s32.totalorder %s251_s8, %s397_s2  ;;  %p403_p12 = scmp.lt.s32.totalorder %s397_s2, %s397_s2 }
  0x3d   :  { %288 = vmatpush3.bf16.msra.mxu0 %v322_v2  ;;  %296 = vmatpush3.bf16.msra.mxu1 %v324_v6  ;;  %p404_p13 = por %p403_p12, %p402_p11 }
  0x3e   :  { %297 = vmatprep.subr.bf16.mxu1 %v430_v0 }
  0x3f   :  { %p405_p0 = pnand %p404_p13, %p398_p10 }
  0x40   :  { %290 = vmatmul.mubr.msk.bf16.vlgmr.msra.gmra.mrb[0].mxu0 %vm86_vm1, %v62_v5 }
  0x41   :  { %298 = vmatpush3.bf16.msra.mxu1 %v325_v7 }
  0x42   :  { %299 = vmatprep.subr.bf16.mxu1 %v430_v0 }
  0x45   :  { %300 = vmatpush3.bf16.msra.mxu1 %v326_v8 }
  0x46   :  { %301 = vmatprep.subr.bf16.mxu1 %v430_v0 }
  0x49   :  { %302 = vmatpush3.bf16.msra.mxu1 %v327_v9 }
  0x4a   :  { %303 = vmatprep.subr.bf16.mxu1 %v430_v0 }
  0x4d   :  { %304 = vmatpush3.bf16.msra.mxu1 %v328_v10 }
  0x4e   :  { %305 = vmatprep.subr.bf16.mxu1 %v430_v0 }
  0x51   :  { %306 = vmatpush3.bf16.msra.mxu1 %v329_v11 }
  0x52   :  { %307 = vmatprep.subr.bf16.mxu1 %v430_v0 }
  0x55   :  { %308 = vmatpush3.bf16.msra.mxu1 %v330_v12 }
 0x113   :  { %v124_v14 = vpop.f32.mrb[0].mxu0 }
 0x114   :  { %v125_v15 = vadd.f32 %v260_v13, %v124_v14  ;;  %v291_v16 = vpop.f32.mrb[1].mxu0 }
 0x115   :  { %v127_v17 = vpop.f32.mrb[2].mxu0 }
 0x116   :  { %v130_v18 = vmax.f32 %v125_v15, 0.0  ;;  %v292_v19 = vpop.f32.mrb[3].mxu0 }
 0x118   :  { %v131_v20 = vpack.c.bf16 %v130_v18, %v130_v18 }
 0x11a   :  { %310 = vmatmul.mubr.bf16.vlgmr.msra.gmra.mrb[0].mxu1 %v131_v20 }
 0x1ed   :  { %v237_v22 = vpop.f32.mrb[0].mxu1 }
 0x1ee   :  { %v238_v23 = vadd.f32 %v264_v21, %v237_v22  ;;  %v311_v24 = vpop.f32.mrb[1].mxu1 }
 0x1ef   :  { %v240_v25 = vpop.f32.mrb[2].mxu1 }
 0x1f0   :  { %243 = vst [vmem:[#allocation8] sm:$0xff] %v238_v23  ;;  %v312_v26 = vpop.f32.mrb[3].mxu1 }
 0x1f1   :  { %408 = shalt.err (!%p405_p0)
}
 0x1f2   :  { %s409_s4 = scalar_lea.hbm %s528_s5, 128 }
 0x1f3   :  { %p410_p1 = scmp.ne.s32.totalorder %s528_s5, %s409_s4  ;;  %p413_p2 = scmp.lt.u32.totalorder %s409_s4, %s528_s5 }
 0x1f5   :  { %p415_p3 = pnand %p413_p2, %p410_p1 }
 0x1f7   :  { %418 = shalt.err (!%p415_p3)
}
 0x1f8   :  { %253 = dma.vmem_to_hbm [thread:$0]  %s251_s8, 128, %s528_s5, [#allocation4]  }
 0x1f9   :  { %423 = dma.done.wait [#allocation4], 128  }
 0x1fa   :  { %424 = vsyncadd [#allocation4], 4294967168 }
 0x1fb   :  { %257 = vsyncpa [#allocation3], 1 }
 0x1fc   :  { %258 = vsyncpa [#allocation6], 1 }
 0x1fd   :  { %259 = vsyncpa [#allocation4], 1 }

// kernel: tpu_custom_call.1
= control target key start
LH: loop header
LB: loop body
LE: loop exit
PB: predicated region body
PF: predicated region fallthrough
CT: control target
= control target key end

     0   :  { %10 = vsyncpa [#allocation3], 0  ;;  %s523_s0 = inlined_call_operand.hbm [shape: f32[8,32], index: 0, kind: input, shape index: {}]   ;;  %s524_s1 = inlined_call_operand.hbm [shape: bf16[32,128], index: 1, kind: input, shape index: {}]   ;;  %s525_s2 = inlined_call_operand.vmem [shape: f32[1,128], index: 2, kind: input, shape index: {}]   ;;  %s526_s3 = inlined_call_operand.hbm [shape: bf16[128,128], index: 3, kind: input, shape index: {}]   ;;  %s527_s4 = inlined_call_operand.vmem [shape: f32[1,128], index: 4, kind: input, shape index: {}]   ;;  %s528_s5 = inlined_call_operand.hbm [shape: f32[8,128], index: 5, kind: output, shape index: {}]  }
   0x1   :  { %11 = vsyncpa [#allocation6], 0 }
   0x2   :  { %12 = vsyncpa [#allocation4], 0  ;;  %s425_s18 = smov [#allocation5]   ;;  %s331_s22 = scalar_lea.hbm %s524_s1, 256 }
   0x3   :  { %s28_s19 = sshll.u32 %s425_s18, 4  ;;  %p332_p0 = scmp.ne.s32.totalorder %s524_s1, %s331_s22  ;;  %s29_s19 = int_to_ptr.vmem [resolvable:$true] %s28_s19 }
   0x4   :  { %p335_p1 = scmp.lt.u32.totalorder %s331_s22, %s524_s1 }
   0x6   :  { %p337_p2 = pnand %p335_p1, %p332_p0 }
   0x8   :  { %340 = shalt.err (!%p337_p2)
}
   0x9   :  { %s341_s27 = scalar_lea.vmem %s29_s19, 256  ;;  %p346_p4 = scmp.lt.s32.totalorder %s29_s19, %s29_s19 }
   0xa   :  { %p342_p3 = scmp.ne.s32.totalorder %s29_s19, %s341_s27  ;;  %p347_p5 = scmp.lt.s32.totalorder %s341_s27, %s341_s27 }
   0xc   :  { %p348_p6 = por %p347_p5, %p346_p4 }
   0xe   :  { %p349_p7 = pnand %p348_p6, %p342_p3 }
  0x10   :  { %352 = shalt.err (!%p349_p7)
}
  0x11   :  { %s426_s28 = smov 64   ;;  %s427_s29 = smov 4  }
  0x12   :  { %34 = dma.hbm_to_vmem [thread:$0]  %s524_s1, 256, %s29_s19, [#allocation6], %s426_s28, %s426_s28, %s427_s29  }
  0x13   :  { %s428_s7 = smov [#allocation2]   ;;  %s429_s9 = smov [#allocation7]  }
  0x14   :  { %s19_s8 = sshll.u32 %s428_s7, 4  ;;  %s42_s10 = sshll.u32 %s429_s9, 4  ;;  %s20_s8 = int_to_ptr.vmem [resolvable:$true] %s19_s8  ;;  %s43_s10 = int_to_ptr.vmem [resolvable:$true] %s42_s10 }
  0x15   :  { %s353_s13 = scalar_lea.hbm %s523_s0, 128 }
  0x16   :  { %p354_p8 = scmp.ne.s32.totalorder %s523_s0, %s353_s13  ;;  %p357_p9 = scmp.lt.u32.totalorder %s353_s13, %s523_s0 }
  0x18   :  { %p359_p10 = pnand %p357_p9, %p354_p8 }
  0x1a   :  { %362 = shalt.err (!%p359_p10)
}
  0x1b   :  { %s363_s1 = scalar_lea.vmem %s20_s8, 128  ;;  %p368_p12 = scmp.lt.s32.totalorder %s20_s8, %s20_s8 }
  0x1c   :  { %p364_p11 = scmp.ne.s32.totalorder %s20_s8, %s363_s1  ;;  %p369_p13 = scmp.lt.s32.totalorder %s363_s1, %s363_s1 }
  0x1e   :  { %p370_p0 = por %p369_p13, %p368_p12 }
  0x20   :  { %p371_p1 = pnand %p370_p0, %p364_p11 }
  0x22   :  { %374 = shalt.err (!%p371_p1)
}
  0x23   :  { %22 = dma.hbm_to_vmem [thread:$0]  %s523_s0, 128, %s20_s8, [#allocation3]  }
  0x24   :  { %s375_s22 = scalar_lea.hbm %s526_s3, 1024 }
  0x25   :  { %p376_p2 = scmp.ne.s32.totalorder %s526_s3, %s375_s22  ;;  %p379_p3 = scmp.lt.u32.totalorder %s375_s22, %s526_s3 }
  0x27   :  { %p381_p4 = pnand %p379_p3, %p376_p2 }
  0x29   :  { %384 = shalt.err (!%p381_p4)
}
  0x2a   :  { %s385_s27 = scalar_lea.vmem %s43_s10, 1024  ;;  %p390_p6 = scmp.lt.s32.totalorder %s43_s10, %s43_s10 }
  0x2b   :  { %p386_p5 = scmp.ne.s32.totalorder %s43_s10, %s385_s27  ;;  %p391_p7 = scmp.lt.s32.totalorder %s385_s27, %s385_s27 }
  0x2d   :  { %p392_p8 = por %p391_p7, %p390_p6 }
  0x2f   :  { %p393_p9 = pnand %p392_p8, %p386_p5 }
  0x31   :  { %396 = shalt.err (!%p393_p9)
}
  0x32   :  { %48 = dma.hbm_to_vmem [thread:$0]  %s526_s3, 1024, %s43_s10, [#allocation6], %s426_s28, %s426_s28, %s427_s29  }
  0x33   :  { %419 = dma.done.wait [#allocation3], 128  }
  0x34   :  { %420 = vsyncadd [#allocation3], 4294967168 }
  0x35   :  { %421 = dma.done.wait [#allocation6], 1280  }
  0x36   :  { %422 = vsyncadd [#allocation6], 4294966016  ;;  %v430_v0 = vmov 0.0   ;;  %vm431_vm0 = vmmov 0   ;;  %v321_v1 = vld [vmem:[#allocation5] sm:$0xff]   ;;  %v322_v2 = vld [vmem:[#allocation5 + $0x8] sm:$0xff]  }
  0x37   :  { %285 = vmatprep.subr.bf16.mxu0 %v430_v0  ;;  %289 = vmatprep.mubr.msk.bf16.mxu0 %vm431_vm0, %v430_v0  ;;  %v61_v3 = vld [vmem:[#allocation2] sm:$0xff]  ;;  %v323_v4 = vld [vmem:[#allocation7] sm:$0xff]   ;;  %vm86_vm1 = vcmask 261120   ;;  %v325_v7 = vld [vmem:[#allocation7 + $0x10] sm:$0xff]   ;;  %s432_s7 = smov [#allocation8]  }
  0x38   :  { %293 = vmatprep.subr.bf16.mxu1 %v430_v0  ;;  %309 = vmatprep.mubr.msk.bf16.mxu1 %vm431_vm0, %v430_v0  ;;  %v62_v5 = vpack.c.bf16 %v61_v3, %v61_v3  ;;  %v324_v6 = vld [vmem:[#allocation7 + $0x8] sm:$0xff]   ;;  %v326_v8 = vld [vmem:[#allocation7 + $0x18] sm:$0xff]   ;;  %v327_v9 = vld [vmem:[#allocation7 + $0x20] sm:$0xff]   ;;  %s250_s8 = sshll.u32 %s432_s7, 4  ;;  %s251_s8 = int_to_ptr.vmem [resolvable:$true] %s250_s8 }
  0x39   :  { %286 = vmatpush3.bf16.msra.mxu0 %v321_v1  ;;  %294 = vmatpush3.bf16.msra.mxu1 %v323_v4  ;;  %v328_v10 = vld [vmem:[#allocation7 + $0x28] sm:$0xff]   ;;  %v329_v11 = vld [vmem:[#allocation7 + $0x30] sm:$0xff]   ;;  %v330_v12 = vld [vmem:[#allocation7 + $0x38] sm:$0xff]   ;;  %p402_p11 = scmp.lt.s32.totalorder %s251_s8, %s251_s8 }
  0x3a   :  { %287 = vmatprep.subr.bf16.mxu0 %v430_v0  ;;  %295 = vmatprep.subr.bf16.mxu1 %v430_v0  ;;  %v260_v13 = vld [vmem:[%s525_s2] ss:$0 sm:$0xff]  ;;  %s397_s2 = scalar_lea.vmem %s251_s8, 128 }
  0x3b   :  { %v264_v21 = vld [vmem:[%s527_s4] ss:$0 sm:$0xff]  ;;  %p398_p10 = scmp.ne.s32.totalorder %s251_s8, %s397_s2  ;;  %p403_p12 = scmp.lt.s32.totalorder %s397_s2, %s397_s2 }
  0x3d   :  { %288 = vmatpush3.bf16.msra.mxu0 %v322_v2  ;;  %296 = vmatpush3.bf16.msra.mxu1 %v324_v6  ;;  %p404_p13 = por %p403_p12, %p402_p11 }
  0x3e   :  { %297 = vmatprep.subr.bf16.mxu1 %v430_v0 }
  0x3f   :  { %p405_p0 = pnand %p404_p13, %p398_p10 }
  0x40   :  { %290 = vmatmul.mubr.msk.bf16.vlgmr.msra.gmra.mrb[0].mxu0 %vm86_vm1, %v62_v5 }
  0x41   :  { %298 = vmatpush3.bf16.msra.mxu1 %v325_v7 }
  0x42   :  { %299 = vmatprep.subr.bf16.mxu1 %v430_v0 }
  0x45   :  { %300 = vmatpush3.bf16.msra.mxu1 %v326_v8 }
  0x46   :  { %301 = vmatprep.subr.bf16.mxu1 %v430_v0 }
  0x49   :  { %302 = vmatpush3.bf16.msra.mxu1 %v327_v9 }
  0x4a   :  { %303 = vmatprep.subr.bf16.mxu1 %v430_v0 }
  0x4d   :  { %304 = vmatpush3.bf16.msra.mxu1 %v328_v10 }
  0x4e   :  { %305 = vmatprep.subr.bf16.mxu1 %v430_v0 }
  0x51   :  { %306 = vmatpush3.bf16.msra.mxu1 %v329_v11 }
  0x52   :  { %307 = vmatprep.subr.bf16.mxu1 %v430_v0 }
  0x55   :  { %308 = vmatpush3.bf16.msra.mxu1 %v330_v12 }
 0x113   :  { %v124_v14 = vpop.f32.mrb[0].mxu0 }
 0x114   :  { %v125_v15 = vadd.f32 %v260_v13, %v124_v14  ;;  %v291_v16 = vpop.f32.mrb[1].mxu0 }
 0x115   :  { %v127_v17 = vpop.f32.mrb[2].mxu0 }
 0x116   :  { %v130_v18 = vmax.f32 %v125_v15, 0.0  ;;  %v292_v19 = vpop.f32.mrb[3].mxu0 }
 0x118   :  { %v131_v20 = vpack.c.bf16 %v130_v18, %v130_v18 }
 0x11a   :  { %310 = vmatmul.mubr.bf16.vlgmr.msra.gmra.mrb[0].mxu1 %v131_v20 }
 0x1ed   :  { %v237_v22 = vpop.f32.mrb[0].mxu1 }
 0x1ee   :  { %v238_v23 = vadd.f32 %v264_v21, %v237_v22  ;;  %v311_v24 = vpop.f32.mrb[1].mxu1 }
 0x1ef   :  { %v240_v25 = vpop.f32.mrb[2].mxu1 }
 0x1f0   :  { %243 = vst [vmem:[#allocation8] sm:$0xff] %v238_v23  ;;  %v312_v26 = vpop.f32.mrb[3].mxu1 }
 0x1f1   :  { %408 = shalt.err (!%p405_p0)
}
 0x1f2   :  { %s409_s4 = scalar_lea.hbm %s528_s5, 128 }
 0x1f3   :  { %p410_p1 = scmp.ne.s32.totalorder %s528_s5, %s409_s4  ;;  %p413_p2 = scmp.lt.u32.totalorder %s409_s4, %s528_s5 }
 0x1f5   :  { %p415_p3 = pnand %p413_p2, %p410_p1 }
 0x1f7   :  { %418 = shalt.err (!%p415_p3)
}
 0x1f8   :  { %253 = dma.vmem_to_hbm [thread:$0]  %s251_s8, 128, %s528_s5, [#allocation4]  }
 0x1f9   :  { %423 = dma.done.wait [#allocation4], 128  }
 0x1fa   :  { %424 = vsyncadd [#allocation4], 4294967168 }
 0x1fb   :  { %257 = vsyncpa [#allocation3], 1 }
 0x1fc   :  { %258 = vsyncpa [#allocation6], 1 }
 0x1fd   :  { %259 = vsyncpa [#allocation4], 1 }

</bundles_post_ra>
